<compile_context>
chip_gen: v7x
topology: tpu7x:2x2x1
jax: 0.10.0
libtpu: 0.0.40
codegen_flags: <defaults>
</compile_context>

<pallas_src>
import functools
import math
import operator

import jax
import jax.numpy as jnp
from jax import lax
from jax.experimental import pallas as pl
from jax.experimental.pallas import tpu as pltpu


# ----------------------------------------------------------------------------
# Hardware-aware helpers
# ----------------------------------------------------------------------------
def _tpu_vmem_capacity_bytes():
    try:
        info = pltpu.get_tpu_info()
        cap = getattr(info, "vmem_capacity_bytes", None)
        if cap:
            return int(cap)
    except Exception:
        pass
    try:
        kind = jax.devices()[0].device_kind.lower()
    except Exception:
        kind = ""
    if "v7" in kind or "7x" in kind:
        return 64 * 2 ** 20
    return 128 * 2 ** 20


def _pick_batch_block(n, per_item_bytes, *, target_bytes, cap=512, min_steps=4):
    """Largest divisor of n whose in+out bytes stay near target_bytes
    (amortizes per-grid-step overhead) while leaving >= min_steps grid steps
    for pipelining / megacore sharding when n is large enough."""
    limit = max(1, min(cap, target_bytes // max(1, per_item_bytes)))
    if n >= 2 * min_steps:
        limit = min(limit, max(1, n // min_steps))
    limit = min(limit, n)
    for nb in range(limit, 0, -1):
        if n % nb == 0:
            return nb
    return 1


# ----------------------------------------------------------------------------
# Fast path: stride == 1, output spatial size == input spatial size ("same").
# ----------------------------------------------------------------------------
def _sepconv_same_kernel(x_ref, wdw_ref, wpw_ref, o_ref, *,
                         kh_sz, kw_sz, dilation, padding, h_dim, w_dim, fold):
    p_flat = h_dim * w_dim
    nb, cg = x_ref.shape[0], x_ref.shape[1]
    o_ch, c_in = wpw_ref.shape                  # unfolded out / in channels
    mxu_dt = jnp.bfloat16 if x_ref.dtype == jnp.bfloat16 else jnp.float32

    # VPU math in f32 on every generation (v5e has no bf16 VALU; on v6e/v7x this
    # kernel is HBM-bound so bf16 VALU throughput is not the bottleneck).
    wdw = wdw_ref[...].astype(jnp.float32)      # (cg, KH*KW), fold-tiled
    wpw = wpw_ref[...].astype(jnp.float32)      # (o_ch, c_in)
    xb = x_ref[...].astype(jnp.float32)         # (nb, cg, P) lane-dense

    # Flat position -> (h, w) along lanes, computed once; padding is realized
    # purely via per-tap validity masks (zeros outside the image).
    pos = lax.broadcasted_iota(jnp.int32, (1, p_flat), 1)
    if (w_dim & (w_dim - 1)) == 0:              # power-of-two W: shifts, no div
        h_idx = pos >> (w_dim.bit_length() - 1)
        w_idx = pos & (w_dim - 1)
    else:
        h_idx = pos // w_dim
        w_idx = pos % w_dim

    taps = []
    for khi in range(kh_sz):
        for kwi in range(kw_sz):
            dh = khi * dilation - padding
            dw = kwi * dilation - padding
            conds = []
            if dh < 0:
                conds.append(h_idx >= -dh)
            if dh > 0:
                conds.append(h_idx < h_dim - dh)
            if dw < 0:
                conds.append(w_idx >= -dw)
            if dw > 0:
                conds.append(w_idx < w_dim - dw)
            mask = functools.reduce(operator.and_, conds)[None] if conds else None
            shift = (-(dh * w_dim + dw)) % p_flat   # roll(x, s)[p] = x[p - s]
            taps.append((khi * kw_sz + kwi, shift, mask))

    # 2D view for lane rolls.  On the fold path cg is a multiple of 8, so the
    # (nb, cg, P) <-> (nb*cg, P) views share the same tiling (free reshape).
    dense = (cg % 8) == 0
    need_roll = any(s != 0 for _, s, _ in taps)
    xb2 = xb.reshape(nb * cg, p_flat) if (dense and need_roll) else None

    # Depthwise conv: whole-block lane rotations (XLU) + masked FMA (VPU).
    acc = jnp.zeros((nb, cg, p_flat), jnp.float32)
    for t, shift, mask in taps:
        if shift == 0:
            sh = xb
        elif dense:
            sh = pltpu.roll(xb2, shift, 1).reshape(nb, cg, p_flat)
        else:
            sh = pltpu.roll(xb, shift, 2)
        if mask is not None:
            sh = jnp.where(mask, sh, 0.0)
        acc = acc + sh * wdw[None, :, t:t + 1]

    # Pointwise 1x1 conv, applied per fold slot (keeps FLOPs minimal; the O
    # output channels sit densely on sublanes).
    if c_in <= 16:
        # Tiny contraction dim: VPU broadcast-FMA; the MXU would be nearly idle.
        for s in range(fold):
            out_s = jnp.zeros((nb, o_ch, p_flat), jnp.float32)
            for ci in range(c_in):
                out_s = out_s + (wpw[None, :, ci:ci + 1]
                                 * acc[:, s * c_in + ci:s * c_in + ci + 1, :])
            o_ref[:, s * o_ch:(s + 1) * o_ch, :] = out_s.astype(o_ref.dtype)
    else:
        # Larger C: one batched MXU contraction per fold slot over the block
        # (amortizes the weight push / result drain across the whole block).
        for s in range(fold):
            acc_s = acc[:, s * c_in:(s + 1) * c_in, :]
            out_s = jnp.einsum("oc,bcp->bop", wpw.astype(mxu_dt),
                               acc_s.astype(mxu_dt),
                               preferred_element_type=jnp.float32)
            o_ref[:, s * o_ch:(s + 1) * o_ch, :] = out_s.astype(o_ref.dtype)


def _sepconv_same(x, w_dw, w_pw, *, padding, dilation):
    n, c, h, w = x.shape
    _, kh, kw = w_dw.shape
    o = w_pw.shape[0]
    p_flat = h * w

    # Fold `fold` samples into the channel axis so the second-minor dim is a
    # multiple of 8 (dense sublanes; halves VMEM footprint vs a C=4 layout).
    fold = 1
    if c % 8 != 0:
        cand = 8 // math.gcd(c, 8)
        if n % cand == 0:
            fold = cand
    nf = n // fold
    cg = fold * c
    og = fold * o

    x_folded = x.reshape(nf, cg, p_flat)                      # contiguous -> free
    wdw_tiled = jnp.tile(w_dw.reshape(c, kh * kw), (fold, 1))  # (cg, KH*KW)

    itemsize = x.dtype.itemsize
    vmem_cap = _tpu_vmem_capacity_bytes()
    budget = min(48 * 2 ** 20, vmem_cap // 2)                 # 32 MiB on v7x
    target_blk = max(1 * 2 ** 20, min(4 * 2 ** 20, vmem_cap // 32))
    per_item = (cg + og) * p_flat * itemsize                  # in+out per folded sample
    nb = _pick_batch_block(nf, per_item, target_bytes=target_blk)
    assert nf % nb == 0, (nf, nb)

    # Double-buffered in/out blocks + weights + f32 temporaries, with headroom.
    need = (2 * nb * per_item
            + (cg * kh * kw + o * c) * 4
            + 2 * nb * (cg + og) * p_flat * 4)
    vmem_limit = int(min(budget, max(24 * 2 ** 20, 2 * need)))

    kernel = functools.partial(
        _sepconv_same_kernel, kh_sz=kh, kw_sz=kw, dilation=dilation,
        padding=padding, h_dim=h, w_dim=w, fold=fold)

    flops = 2 * n * p_flat * c * (kh * kw + o)
    bytes_accessed = (n * (c + o) * p_flat + c * kh * kw + o * c) * itemsize

    # NOTE: pipeline_mode=pl.Buffered(3) on the input spec is an option if large-N
    # runs remain DMA-latency exposed after the bigger blocks.
    out_folded = pl.pallas_call(
        kernel,
        out_shape=jax.ShapeDtypeStruct((nf, og, p_flat), x.dtype),
        grid_spec=pltpu.PrefetchScalarGridSpec(
            num_scalar_prefetch=0,
            grid=(nf // nb,),
            in_specs=[
                pl.BlockSpec((nb, cg, p_flat), lambda i: (i, 0, 0)),
                pl.BlockSpec((cg, kh * kw), lambda i: (0, 0)),
                pl.BlockSpec((o, c), lambda i: (0, 0)),
            ],
            out_specs=pl.BlockSpec((nb, og, p_flat), lambda i: (i, 0, 0)),
        ),
        compiler_params=pltpu.CompilerParams(
            dimension_semantics=("parallel",),
            vmem_limit_bytes=vmem_limit),
        cost_estimate=pl.CostEstimate(flops=flops, transcendentals=0,
                                      bytes_accessed=bytes_accessed),
    )(x_folded, wdw_tiled, w_pw)

    return out_folded.reshape(n, o, h, w)


# ----------------------------------------------------------------------------
# General fallback: arbitrary stride / padding / dilation.
# ----------------------------------------------------------------------------
def _sepconv_general_kernel(x_ref, wdw_ref, wpw_ref, o_ref, *,
                            kh_sz, kw_sz, stride, dilation, h_out, w_out):
    x = x_ref[...].astype(jnp.float32)        # (nb, C, Hp, Wp) padded input
    wdw = wdw_ref[...].astype(jnp.float32)    # (C, KH*KW)
    wpw = wpw_ref[...].astype(jnp.float32)    # (O, C)
    nb, c = x.shape[0], x.shape[1]
    o_ch = wpw.shape[0]
    p_out = h_out * w_out

    # TODO(synk): stride > 1 lane-axis strided slices remain a Mosaic relayout
    # hazard; this path is only used for non-"same" configurations.
    acc = jnp.zeros((nb, c, h_out, w_out), jnp.float32)
    for khi in range(kh_sz):
        for kwi in range(kw_sz):
            h0 = khi * dilation
            w0 = kwi * dilation
            patch = lax.slice(
                x, (0, 0, h0, w0),
                (nb, c, h0 + (h_out - 1) * stride + 1,
                 w0 + (w_out - 1) * stride + 1),
                (1, 1, stride, stride))
            acc = acc + patch * wdw[:, khi * kw_sz + kwi][None, :, None, None]

    acc = acc.reshape(nb, c, p_out)           # lane-dense for pointwise + store
    if c <= 16:
        out = jnp.zeros((nb, o_ch, p_out), jnp.float32)
        for ci in range(c):
            out = out + wpw[None, :, ci:ci + 1] * acc[:, ci:ci + 1, :]
    else:
        out = jnp.einsum("oc,bcp->bop", wpw, acc,
                         preferred_element_type=jnp.float32)
    o_ref[...] = out.astype(o_ref.dtype)


def _sepconv_general(x, w_dw, w_pw, *, stride, padding, dilation, h_out, w_out):
    n, c, h, w = x.shape
    _, kh, kw = w_dw.shape
    o = w_pw.shape[0]
    p_out = h_out * w_out

    # TODO(synk): the pad could be folded into in-kernel tap masks (as in the
    # fast path) to avoid this extra HBM round trip of the activation.
    xp = jnp.pad(x, ((0, 0), (0, 0), (padding, padding), (padding, padding)))
    hp, wp = h + 2 * padding, w + 2 * padding

    itemsize = x.dtype.itemsize
    vmem_cap = _tpu_vmem_capacity_bytes()
    target_blk = max(1 * 2 ** 20, min(4 * 2 ** 20, vmem_cap // 32))
    per_item = (c * hp * wp + o * p_out) * itemsize
    nb = _pick_batch_block(n, per_item, target_bytes=target_blk, cap=64)
    assert n % nb == 0, (n, nb)

    kernel = functools.partial(
        _sepconv_general_kernel, kh_sz=kh, kw_sz=kw, stride=stride,
        dilation=dilation, h_out=h_out, w_out=w_out)

    out_flat = pl.pallas_call(
        kernel,
        out_shape=jax.ShapeDtypeStruct((n, o, p_out), x.dtype),
        grid_spec=pltpu.PrefetchScalarGridSpec(
            num_scalar_prefetch=0,
            grid=(n // nb,),
            in_specs=[
                pl.BlockSpec((nb, c, hp, wp), lambda i: (i, 0, 0, 0)),
                pl.BlockSpec((c, kh * kw), lambda i: (0, 0)),
                pl.BlockSpec((o, c), lambda i: (0, 0)),
            ],
            out_specs=pl.BlockSpec((nb, o, p_out), lambda i: (i, 0, 0)),
        ),
        compiler_params=pltpu.CompilerParams(
            dimension_semantics=("parallel",),
            vmem_limit_bytes=int(min(vmem_cap // 2, 48 * 2 ** 20))),
    )(xp, w_dw.reshape(c, kh * kw), w_pw)

    return out_flat.reshape(n, o, h_out, w_out)


# ----------------------------------------------------------------------------
# Public wrapper (matches the PyTorch SeparableConv2d forward, bias=False).
# ----------------------------------------------------------------------------
def separable_conv2d(x, w_dw, w_pw, *, stride=1, padding=0, dilation=1):
    """x: (N, C, H, W); w_dw: (C, KH, KW); w_pw: (O, C). Returns (N, O, Ho, Wo)."""
    n, c, h, w = x.shape
    c_dw, kh, kw = w_dw.shape
    o, c_pw = w_pw.shape
    assert c_dw == c and c_pw == c

    h_out = (h + 2 * padding - dilation * (kh - 1) - 1) // stride + 1
    w_out = (w + 2 * padding - dilation * (kw - 1) - 1) // stride + 1

    if stride == 1 and h_out == h and w_out == w:
        return _sepconv_same(x, w_dw, w_pw, padding=padding, dilation=dilation)
    return _sepconv_general(x, w_dw, w_pw, stride=stride, padding=padding,
                            dilation=dilation, h_out=h_out, w_out=w_out)


def _reference(x, w_dw4, w_pw4, *, stride, padding, dilation):
    """Pure-JAX reference mirroring the PyTorch module (for verification)."""
    dw = lax.conv_general_dilated(
        x, w_dw4, window_strides=(stride, stride),
        padding=((padding, padding), (padding, padding)),
        rhs_dilation=(dilation, dilation),
        dimension_numbers=("NCHW", "OIHW", "NCHW"),
        feature_group_count=x.shape[1])
    return lax.conv_general_dilated(
        dw, w_pw4, window_strides=(1, 1), padding="VALID",
        dimension_numbers=("NCHW", "OIHW", "NCHW"))


if __name__ == "__main__":
    in_channels, out_channels = 4, 8

    key = jax.random.PRNGKey(0)
    kx, kdw, kpw = jax.random.split(key, 3)

    x = jax.random.normal(kx, (2, in_channels, 16, 16), dtype=jnp.float32)

    def make_weights(kernel_size):
        bound_dw = 1.0 / (1 * kernel_size * kernel_size) ** 0.5
        w_dw4 = jax.random.uniform(kdw, (in_channels, 1, kernel_size, kernel_size),
                                   jnp.float32, -bound_dw, bound_dw)
        bound_pw = 1.0 / in_channels ** 0.5
        w_pw4 = jax.random.uniform(kpw, (out_channels, in_channels, 1, 1),
                                   jnp.float32, -bound_pw, bound_pw)
        return w_dw4, w_pw4

    # Config 1: kernel_size=3, padding=1 ("same"-size fast path).
    w_dw4, w_pw4 = make_weights(3)
    out = separable_conv2d(x, w_dw4[:, 0], w_pw4[:, :, 0, 0],
                           stride=1, padding=1, dilation=1)
    out = jax.block_until_ready(out)
    ref = _reference(x, w_dw4, w_pw4, stride=1, padding=1, dilation=1)
    assert out.shape == ref.shape, (out.shape, ref.shape)
    assert jnp.allclose(out, ref, atol=1e-4, rtol=1e-4), "mismatch (3x3, pad=1)"

    # Config 2: module defaults kernel_size=1, padding=0 (also fast path).
    w_dw4_1, w_pw4_1 = make_weights(1)
    out1 = separable_conv2d(x, w_dw4_1[:, 0], w_pw4_1[:, :, 0, 0],
                            stride=1, padding=0, dilation=1)
    out1 = jax.block_until_ready(out1)
    ref1 = _reference(x, w_dw4_1, w_pw4_1, stride=1, padding=0, dilation=1)
    assert jnp.allclose(out1, ref1, atol=1e-4, rtol=1e-4), "mismatch (1x1)"

    # Config 3: kernel_size=3, padding=0 -> 14x14 output (general path, stride=1).
    out2 = separable_conv2d(x, w_dw4[:, 0], w_pw4[:, :, 0, 0],
                            stride=1, padding=0, dilation=1)
    out2 = jax.block_until_ready(out2)
    ref2 = _reference(x, w_dw4, w_pw4, stride=1, padding=0, dilation=1)
    assert out2.shape == ref2.shape, (out2.shape, ref2.shape)
    assert jnp.allclose(out2, ref2, atol=1e-4, rtol=1e-4), "mismatch (3x3, pad=0)"

    # Config 4: bf16 inputs through the fast path (looser tolerance).
    outb = separable_conv2d(x.astype(jnp.bfloat16),
                            w_dw4[:, 0].astype(jnp.bfloat16),
                            w_pw4[:, :, 0, 0].astype(jnp.bfloat16),
                            stride=1, padding=1, dilation=1)
    outb = jax.block_until_ready(outb)
    assert jnp.allclose(outb.astype(jnp.float32), ref, atol=6e-2, rtol=5e-2), \
        "mismatch (bf16)"

    print("KERNEL_OK")
</pallas_src>

<mosaic_0001>
module attributes {stable_mosaic.version = 11 : i64} {
  func.func @_sepconv_same_kernel(%arg0: i32, %arg1: memref<1x8x256xf32, #tpu.memory_space<vmem>>, %arg2: memref<8x9xf32, #tpu.memory_space<vmem>>, %arg3: memref<8x4xf32, #tpu.memory_space<vmem>>, %arg4: memref<1x16x256xf32, #tpu.memory_space<vmem>>) attributes {dimension_semantics = [#tpu.dimension_semantics<parallel>], iteration_bounds = array<i64: 1>, scalar_prefetch = 0 : i64, scratch_operands = 0 : i64, tpu.core_type = #tpu.core_type<tc>, window_params = [{transform_indices = @transform_0, window_bounds = array<i64: 1, 8, 256>}, {pipeline_mode = #tpu.pipeline_mode<synchronous>, transform_indices = @transform_1, window_bounds = array<i64: 8, 9>}, {pipeline_mode = #tpu.pipeline_mode<synchronous>, transform_indices = @transform_2, window_bounds = array<i64: 8, 4>}, {transform_indices = @transform_3, window_bounds = array<i64: 1, 16, 256>}]} {
    %c0 = arith.constant 0 : index
    %c0_0 = arith.constant 0 : index
    %0 = vector.load %arg2[%c0, %c0_0] : memref<8x9xf32, #tpu.memory_space<vmem>>, vector<8x9xf32>
    %c0_1 = arith.constant 0 : index
    %c0_2 = arith.constant 0 : index
    %1 = vector.load %arg3[%c0_1, %c0_2] : memref<8x4xf32, #tpu.memory_space<vmem>>, vector<8x4xf32>
    %c0_3 = arith.constant 0 : index
    %c0_4 = arith.constant 0 : index
    %c0_5 = arith.constant 0 : index
    %2 = vector.load %arg1[%c0_3, %c0_4, %c0_5] : memref<1x8x256xf32, #tpu.memory_space<vmem>>, vector<1x8x256xf32>
    %3 = tpu.iota {dimensions = array<i32: 1>} : vector<1x256xi32>
    %c4_i32 = arith.constant 4 : i32
    %4 = vector.broadcast %c4_i32 : i32 to vector<1x256xi32>
    %5 = arith.shrsi %3, %4 : vector<1x256xi32>
    %c15_i32 = arith.constant 15 : i32
    %6 = vector.broadcast %c15_i32 : i32 to vector<1x256xi32>
    %7 = arith.andi %3, %6 : vector<1x256xi32>
    %c1_i32 = arith.constant 1 : i32
    %8 = vector.broadcast %c1_i32 : i32 to vector<1x256xi32>
    %9 = arith.cmpi sge, %5, %8 : vector<1x256xi32>
    %c1_i32_6 = arith.constant 1 : i32
    %10 = vector.broadcast %c1_i32_6 : i32 to vector<1x256xi32>
    %11 = arith.cmpi sge, %7, %10 : vector<1x256xi32>
    %12 = arith.andi %9, %11 : vector<1x256xi1>
    %13 = vector.shape_cast %12 : vector<1x256xi1> to vector<1x1x256xi1>
    %c1_i32_7 = arith.constant 1 : i32
    %14 = vector.broadcast %c1_i32_7 : i32 to vector<1x256xi32>
    %15 = arith.cmpi sge, %5, %14 : vector<1x256xi32>
    %16 = vector.shape_cast %15 : vector<1x256xi1> to vector<1x1x256xi1>
    %c1_i32_8 = arith.constant 1 : i32
    %17 = vector.broadcast %c1_i32_8 : i32 to vector<1x256xi32>
    %18 = arith.cmpi sge, %5, %17 : vector<1x256xi32>
    %c15_i32_9 = arith.constant 15 : i32
    %19 = vector.broadcast %c15_i32_9 : i32 to vector<1x256xi32>
    %20 = arith.cmpi slt, %7, %19 : vector<1x256xi32>
    %21 = arith.andi %18, %20 : vector<1x256xi1>
    %22 = vector.shape_cast %21 : vector<1x256xi1> to vector<1x1x256xi1>
    %c1_i32_10 = arith.constant 1 : i32
    %23 = vector.broadcast %c1_i32_10 : i32 to vector<1x256xi32>
    %24 = arith.cmpi sge, %7, %23 : vector<1x256xi32>
    %25 = vector.shape_cast %24 : vector<1x256xi1> to vector<1x1x256xi1>
    %c15_i32_11 = arith.constant 15 : i32
    %26 = vector.broadcast %c15_i32_11 : i32 to vector<1x256xi32>
    %27 = arith.cmpi slt, %7, %26 : vector<1x256xi32>
    %28 = vector.shape_cast %27 : vector<1x256xi1> to vector<1x1x256xi1>
    %c15_i32_12 = arith.constant 15 : i32
    %29 = vector.broadcast %c15_i32_12 : i32 to vector<1x256xi32>
    %30 = arith.cmpi slt, %5, %29 : vector<1x256xi32>
    %c1_i32_13 = arith.constant 1 : i32
    %31 = vector.broadcast %c1_i32_13 : i32 to vector<1x256xi32>
    %32 = arith.cmpi sge, %7, %31 : vector<1x256xi32>
    %33 = arith.andi %30, %32 : vector<1x256xi1>
    %34 = vector.shape_cast %33 : vector<1x256xi1> to vector<1x1x256xi1>
    %c15_i32_14 = arith.constant 15 : i32
    %35 = vector.broadcast %c15_i32_14 : i32 to vector<1x256xi32>
    %36 = arith.cmpi slt, %5, %35 : vector<1x256xi32>
    %37 = vector.shape_cast %36 : vector<1x256xi1> to vector<1x1x256xi1>
    %c15_i32_15 = arith.constant 15 : i32
    %38 = vector.broadcast %c15_i32_15 : i32 to vector<1x256xi32>
    %39 = arith.cmpi slt, %5, %38 : vector<1x256xi32>
    %c15_i32_16 = arith.constant 15 : i32
    %40 = vector.broadcast %c15_i32_16 : i32 to vector<1x256xi32>
    %41 = arith.cmpi slt, %7, %40 : vector<1x256xi32>
    %42 = arith.andi %39, %41 : vector<1x256xi1>
    %43 = vector.shape_cast %42 : vector<1x256xi1> to vector<1x1x256xi1>
    %44 = vector.shape_cast %2 : vector<1x8x256xf32> to vector<8x256xf32>
    %cst = arith.constant 0.000000e+00 : f32
    %45 = vector.broadcast %cst : f32 to vector<1x8x256xf32>
    %c17_i32 = arith.constant 17 : i32
    %46 = tpu.dynamic_rotate %44 by %c17_i32 dim 1 : vector<8x256xf32>, i32 -> vector<8x256xf32>
    %47 = vector.shape_cast %46 : vector<8x256xf32> to vector<1x8x256xf32>
    %cst_17 = arith.constant 0.000000e+00 : f32
    %48 = vector.shape_cast %13 : vector<1x1x256xi1> to vector<1x1x256xi1>
    %49 = vector.broadcast %48 : vector<1x1x256xi1> to vector<1x8x256xi1>
    %50 = vector.broadcast %cst_17 : f32 to vector<1x8x256xf32>
    %51 = arith.select %49, %47, %50 : vector<1x8x256xi1>, vector<1x8x256xf32>
    %52 = vector.extract_strided_slice %0 {offsets = [0, 0], sizes = [8, 1], strides = [1, 1]} : vector<8x9xf32> to vector<8x1xf32>
    %53 = vector.shape_cast %52 : vector<8x1xf32> to vector<1x8x1xf32>
    %54 = vector.broadcast %53 : vector<1x8x1xf32> to vector<1x8x256xf32>
    %55 = arith.mulf %51, %54 : vector<1x8x256xf32>
    %56 = arith.addf %45, %55 : vector<1x8x256xf32>
    %c16_i32 = arith.constant 16 : i32
    %57 = tpu.dynamic_rotate %44 by %c16_i32 dim 1 : vector<8x256xf32>, i32 -> vector<8x256xf32>
    %58 = vector.shape_cast %57 : vector<8x256xf32> to vector<1x8x256xf32>
    %cst_18 = arith.constant 0.000000e+00 : f32
    %59 = vector.shape_cast %16 : vector<1x1x256xi1> to vector<1x1x256xi1>
    %60 = vector.broadcast %59 : vector<1x1x256xi1> to vector<1x8x256xi1>
    %61 = vector.broadcast %cst_18 : f32 to vector<1x8x256xf32>
    %62 = arith.select %60, %58, %61 : vector<1x8x256xi1>, vector<1x8x256xf32>
    %63 = vector.extract_strided_slice %0 {offsets = [0, 1], sizes = [8, 1], strides = [1, 1]} : vector<8x9xf32> to vector<8x1xf32>
    %64 = vector.shape_cast %63 : vector<8x1xf32> to vector<1x8x1xf32>
    %65 = vector.broadcast %64 : vector<1x8x1xf32> to vector<1x8x256xf32>
    %66 = arith.mulf %62, %65 : vector<1x8x256xf32>
    %67 = arith.addf %56, %66 : vector<1x8x256xf32>
    %c15_i32_19 = arith.constant 15 : i32
    %68 = tpu.dynamic_rotate %44 by %c15_i32_19 dim 1 : vector<8x256xf32>, i32 -> vector<8x256xf32>
    %69 = vector.shape_cast %68 : vector<8x256xf32> to vector<1x8x256xf32>
    %cst_20 = arith.constant 0.000000e+00 : f32
    %70 = vector.shape_cast %22 : vector<1x1x256xi1> to vector<1x1x256xi1>
    %71 = vector.broadcast %70 : vector<1x1x256xi1> to vector<1x8x256xi1>
    %72 = vector.broadcast %cst_20 : f32 to vector<1x8x256xf32>
    %73 = arith.select %71, %69, %72 : vector<1x8x256xi1>, vector<1x8x256xf32>
    %74 = vector.extract_strided_slice %0 {offsets = [0, 2], sizes = [8, 1], strides = [1, 1]} : vector<8x9xf32> to vector<8x1xf32>
    %75 = vector.shape_cast %74 : vector<8x1xf32> to vector<1x8x1xf32>
    %76 = vector.broadcast %75 : vector<1x8x1xf32> to vector<1x8x256xf32>
    %77 = arith.mulf %73, %76 : vector<1x8x256xf32>
    %78 = arith.addf %67, %77 : vector<1x8x256xf32>
    %c1_i32_21 = arith.constant 1 : i32
    %79 = tpu.dynamic_rotate %44 by %c1_i32_21 dim 1 : vector<8x256xf32>, i32 -> vector<8x256xf32>
    %80 = vector.shape_cast %79 : vector<8x256xf32> to vector<1x8x256xf32>
    %cst_22 = arith.constant 0.000000e+00 : f32
    %81 = vector.shape_cast %25 : vector<1x1x256xi1> to vector<1x1x256xi1>
    %82 = vector.broadcast %81 : vector<1x1x256xi1> to vector<1x8x256xi1>
    %83 = vector.broadcast %cst_22 : f32 to vector<1x8x256xf32>
    %84 = arith.select %82, %80, %83 : vector<1x8x256xi1>, vector<1x8x256xf32>
    %85 = vector.extract_strided_slice %0 {offsets = [0, 3], sizes = [8, 1], strides = [1, 1]} : vector<8x9xf32> to vector<8x1xf32>
    %86 = vector.shape_cast %85 : vector<8x1xf32> to vector<1x8x1xf32>
    %87 = vector.broadcast %86 : vector<1x8x1xf32> to vector<1x8x256xf32>
    %88 = arith.mulf %84, %87 : vector<1x8x256xf32>
    %89 = arith.addf %78, %88 : vector<1x8x256xf32>
    %90 = vector.extract_strided_slice %0 {offsets = [0, 4], sizes = [8, 1], strides = [1, 1]} : vector<8x9xf32> to vector<8x1xf32>
    %91 = vector.shape_cast %90 : vector<8x1xf32> to vector<1x8x1xf32>
    %92 = vector.broadcast %91 : vector<1x8x1xf32> to vector<1x8x256xf32>
    %93 = arith.mulf %2, %92 : vector<1x8x256xf32>
    %94 = arith.addf %89, %93 : vector<1x8x256xf32>
    %c255_i32 = arith.constant 255 : i32
    %95 = tpu.dynamic_rotate %44 by %c255_i32 dim 1 : vector<8x256xf32>, i32 -> vector<8x256xf32>
    %96 = vector.shape_cast %95 : vector<8x256xf32> to vector<1x8x256xf32>
    %cst_23 = arith.constant 0.000000e+00 : f32
    %97 = vector.shape_cast %28 : vector<1x1x256xi1> to vector<1x1x256xi1>
    %98 = vector.broadcast %97 : vector<1x1x256xi1> to vector<1x8x256xi1>
    %99 = vector.broadcast %cst_23 : f32 to vector<1x8x256xf32>
    %100 = arith.select %98, %96, %99 : vector<1x8x256xi1>, vector<1x8x256xf32>
    %101 = vector.extract_strided_slice %0 {offsets = [0, 5], sizes = [8, 1], strides = [1, 1]} : vector<8x9xf32> to vector<8x1xf32>
    %102 = vector.shape_cast %101 : vector<8x1xf32> to vector<1x8x1xf32>
    %103 = vector.broadcast %102 : vector<1x8x1xf32> to vector<1x8x256xf32>
    %104 = arith.mulf %100, %103 : vector<1x8x256xf32>
    %105 = arith.addf %94, %104 : vector<1x8x256xf32>
    %c241_i32 = arith.constant 241 : i32
    %106 = tpu.dynamic_rotate %44 by %c241_i32 dim 1 : vector<8x256xf32>, i32 -> vector<8x256xf32>
    %107 = vector.shape_cast %106 : vector<8x256xf32> to vector<1x8x256xf32>
    %cst_24 = arith.constant 0.000000e+00 : f32
    %108 = vector.shape_cast %34 : vector<1x1x256xi1> to vector<1x1x256xi1>
    %109 = vector.broadcast %108 : vector<1x1x256xi1> to vector<1x8x256xi1>
    %110 = vector.broadcast %cst_24 : f32 to vector<1x8x256xf32>
    %111 = arith.select %109, %107, %110 : vector<1x8x256xi1>, vector<1x8x256xf32>
    %112 = vector.extract_strided_slice %0 {offsets = [0, 6], sizes = [8, 1], strides = [1, 1]} : vector<8x9xf32> to vector<8x1xf32>
    %113 = vector.shape_cast %112 : vector<8x1xf32> to vector<1x8x1xf32>
    %114 = vector.broadcast %113 : vector<1x8x1xf32> to vector<1x8x256xf32>
    %115 = arith.mulf %111, %114 : vector<1x8x256xf32>
    %116 = arith.addf %105, %115 : vector<1x8x256xf32>
    %c240_i32 = arith.constant 240 : i32
    %117 = tpu.dynamic_rotate %44 by %c240_i32 dim 1 : vector<8x256xf32>, i32 -> vector<8x256xf32>
    %118 = vector.shape_cast %117 : vector<8x256xf32> to vector<1x8x256xf32>
    %cst_25 = arith.constant 0.000000e+00 : f32
    %119 = vector.shape_cast %37 : vector<1x1x256xi1> to vector<1x1x256xi1>
    %120 = vector.broadcast %119 : vector<1x1x256xi1> to vector<1x8x256xi1>
    %121 = vector.broadcast %cst_25 : f32 to vector<1x8x256xf32>
    %122 = arith.select %120, %118, %121 : vector<1x8x256xi1>, vector<1x8x256xf32>
    %123 = vector.extract_strided_slice %0 {offsets = [0, 7], sizes = [8, 1], strides = [1, 1]} : vector<8x9xf32> to vector<8x1xf32>
    %124 = vector.shape_cast %123 : vector<8x1xf32> to vector<1x8x1xf32>
    %125 = vector.broadcast %124 : vector<1x8x1xf32> to vector<1x8x256xf32>
    %126 = arith.mulf %122, %125 : vector<1x8x256xf32>
    %127 = arith.addf %116, %126 : vector<1x8x256xf32>
    %c239_i32 = arith.constant 239 : i32
    %128 = tpu.dynamic_rotate %44 by %c239_i32 dim 1 : vector<8x256xf32>, i32 -> vector<8x256xf32>
    %129 = vector.shape_cast %128 : vector<8x256xf32> to vector<1x8x256xf32>
    %cst_26 = arith.constant 0.000000e+00 : f32
    %130 = vector.shape_cast %43 : vector<1x1x256xi1> to vector<1x1x256xi1>
    %131 = vector.broadcast %130 : vector<1x1x256xi1> to vector<1x8x256xi1>
    %132 = vector.broadcast %cst_26 : f32 to vector<1x8x256xf32>
    %133 = arith.select %131, %129, %132 : vector<1x8x256xi1>, vector<1x8x256xf32>
    %134 = vector.extract_strided_slice %0 {offsets = [0, 8], sizes = [8, 1], strides = [1, 1]} : vector<8x9xf32> to vector<8x1xf32>
    %135 = vector.shape_cast %134 : vector<8x1xf32> to vector<1x8x1xf32>
    %136 = vector.broadcast %135 : vector<1x8x1xf32> to vector<1x8x256xf32>
    %137 = arith.mulf %133, %136 : vector<1x8x256xf32>
    %138 = arith.addf %127, %137 : vector<1x8x256xf32>
    %cst_27 = arith.constant 0.000000e+00 : f32
    %139 = vector.broadcast %cst_27 : f32 to vector<1x8x256xf32>
    %140 = vector.extract_strided_slice %1 {offsets = [0, 0], sizes = [8, 1], strides = [1, 1]} : vector<8x4xf32> to vector<8x1xf32>
    %141 = vector.shape_cast %140 : vector<8x1xf32> to vector<1x8x1xf32>
    %142 = vector.extract_strided_slice %138 {offsets = [0, 0, 0], sizes = [1, 1, 256], strides = [1, 1, 1]} : vector<1x8x256xf32> to vector<1x1x256xf32>
    %143 = vector.broadcast %141 : vector<1x8x1xf32> to vector<1x8x256xf32>
    %144 = vector.broadcast %142 : vector<1x1x256xf32> to vector<1x8x256xf32>
    %145 = arith.mulf %143, %144 : vector<1x8x256xf32>
    %146 = arith.addf %139, %145 : vector<1x8x256xf32>
    %147 = vector.extract_strided_slice %1 {offsets = [0, 1], sizes = [8, 1], strides = [1, 1]} : vector<8x4xf32> to vector<8x1xf32>
    %148 = vector.shape_cast %147 : vector<8x1xf32> to vector<1x8x1xf32>
    %149 = vector.extract_strided_slice %138 {offsets = [0, 1, 0], sizes = [1, 1, 256], strides = [1, 1, 1]} : vector<1x8x256xf32> to vector<1x1x256xf32>
    %150 = vector.broadcast %148 : vector<1x8x1xf32> to vector<1x8x256xf32>
    %151 = vector.broadcast %149 : vector<1x1x256xf32> to vector<1x8x256xf32>
    %152 = arith.mulf %150, %151 : vector<1x8x256xf32>
    %153 = arith.addf %146, %152 : vector<1x8x256xf32>
    %154 = vector.extract_strided_slice %1 {offsets = [0, 2], sizes = [8, 1], strides = [1, 1]} : vector<8x4xf32> to vector<8x1xf32>
    %155 = vector.shape_cast %154 : vector<8x1xf32> to vector<1x8x1xf32>
    %156 = vector.extract_strided_slice %138 {offsets = [0, 2, 0], sizes = [1, 1, 256], strides = [1, 1, 1]} : vector<1x8x256xf32> to vector<1x1x256xf32>
    %157 = vector.broadcast %155 : vector<1x8x1xf32> to vector<1x8x256xf32>
    %158 = vector.broadcast %156 : vector<1x1x256xf32> to vector<1x8x256xf32>
    %159 = arith.mulf %157, %158 : vector<1x8x256xf32>
    %160 = arith.addf %153, %159 : vector<1x8x256xf32>
    %161 = vector.extract_strided_slice %1 {offsets = [0, 3], sizes = [8, 1], strides = [1, 1]} : vector<8x4xf32> to vector<8x1xf32>
    %162 = vector.shape_cast %161 : vector<8x1xf32> to vector<1x8x1xf32>
    %163 = vector.extract_strided_slice %138 {offsets = [0, 3, 0], sizes = [1, 1, 256], strides = [1, 1, 1]} : vector<1x8x256xf32> to vector<1x1x256xf32>
    %164 = vector.broadcast %162 : vector<1x8x1xf32> to vector<1x8x256xf32>
    %165 = vector.broadcast %163 : vector<1x1x256xf32> to vector<1x8x256xf32>
    %166 = arith.mulf %164, %165 : vector<1x8x256xf32>
    %167 = arith.addf %160, %166 : vector<1x8x256xf32>
    %c0_28 = arith.constant 0 : index
    %c0_29 = arith.constant 0 : index
    %c0_30 = arith.constant 0 : index
    %168 = vector.load %arg4[%c0_28, %c0_29, %c0_30] : memref<1x16x256xf32, #tpu.memory_space<vmem>>, vector<1x8x256xf32>
    tpu.vector_store %arg4[%c0_28, %c0_29, %c0_30], %167 {strides = array<i32>} : memref<1x16x256xf32, #tpu.memory_space<vmem>>, vector<1x8x256xf32>,
    %cst_31 = arith.constant 0.000000e+00 : f32
    %169 = vector.broadcast %cst_31 : f32 to vector<1x8x256xf32>
    %170 = vector.extract_strided_slice %1 {offsets = [0, 0], sizes = [8, 1], strides = [1, 1]} : vector<8x4xf32> to vector<8x1xf32>
    %171 = vector.shape_cast %170 : vector<8x1xf32> to vector<1x8x1xf32>
    %172 = vector.extract_strided_slice %138 {offsets = [0, 4, 0], sizes = [1, 1, 256], strides = [1, 1, 1]} : vector<1x8x256xf32> to vector<1x1x256xf32>
    %173 = vector.broadcast %171 : vector<1x8x1xf32> to vector<1x8x256xf32>
    %174 = vector.broadcast %172 : vector<1x1x256xf32> to vector<1x8x256xf32>
    %175 = arith.mulf %173, %174 : vector<1x8x256xf32>
    %176 = arith.addf %169, %175 : vector<1x8x256xf32>
    %177 = vector.extract_strided_slice %1 {offsets = [0, 1], sizes = [8, 1], strides = [1, 1]} : vector<8x4xf32> to vector<8x1xf32>
    %178 = vector.shape_cast %177 : vector<8x1xf32> to vector<1x8x1xf32>
    %179 = vector.extract_strided_slice %138 {offsets = [0, 5, 0], sizes = [1, 1, 256], strides = [1, 1, 1]} : vector<1x8x256xf32> to vector<1x1x256xf32>
    %180 = vector.broadcast %178 : vector<1x8x1xf32> to vector<1x8x256xf32>
    %181 = vector.broadcast %179 : vector<1x1x256xf32> to vector<1x8x256xf32>
    %182 = arith.mulf %180, %181 : vector<1x8x256xf32>
    %183 = arith.addf %176, %182 : vector<1x8x256xf32>
    %184 = vector.extract_strided_slice %1 {offsets = [0, 2], sizes = [8, 1], strides = [1, 1]} : vector<8x4xf32> to vector<8x1xf32>
    %185 = vector.shape_cast %184 : vector<8x1xf32> to vector<1x8x1xf32>
    %186 = vector.extract_strided_slice %138 {offsets = [0, 6, 0], sizes = [1, 1, 256], strides = [1, 1, 1]} : vector<1x8x256xf32> to vector<1x1x256xf32>
    %187 = vector.broadcast %185 : vector<1x8x1xf32> to vector<1x8x256xf32>
    %188 = vector.broadcast %186 : vector<1x1x256xf32> to vector<1x8x256xf32>
    %189 = arith.mulf %187, %188 : vector<1x8x256xf32>
    %190 = arith.addf %183, %189 : vector<1x8x256xf32>
    %191 = vector.extract_strided_slice %1 {offsets = [0, 3], sizes = [8, 1], strides = [1, 1]} : vector<8x4xf32> to vector<8x1xf32>
    %192 = vector.shape_cast %191 : vector<8x1xf32> to vector<1x8x1xf32>
    %193 = vector.extract_strided_slice %138 {offsets = [0, 7, 0], sizes = [1, 1, 256], strides = [1, 1, 1]} : vector<1x8x256xf32> to vector<1x1x256xf32>
    %194 = vector.broadcast %192 : vector<1x8x1xf32> to vector<1x8x256xf32>
    %195 = vector.broadcast %193 : vector<1x1x256xf32> to vector<1x8x256xf32>
    %196 = arith.mulf %194, %195 : vector<1x8x256xf32>
    %197 = arith.addf %190, %196 : vector<1x8x256xf32>
    %c0_32 = arith.constant 0 : index
    %c8 = arith.constant 8 : index
    %c0_33 = arith.constant 0 : index
    %198 = vector.load %arg4[%c0_32, %c8, %c0_33] : memref<1x16x256xf32, #tpu.memory_space<vmem>>, vector<1x8x256xf32>
    tpu.vector_store %arg4[%c0_32, %c8, %c0_33], %197 {strides = array<i32>} : memref<1x16x256xf32, #tpu.memory_space<vmem>>, vector<1x8x256xf32>,
    return
  }
  func.func @transform_0(%arg0: i32) -> (i32, i32, i32) {
    %c0_i32 = arith.constant 0 : i32
    %c0_i32_0 = arith.constant 0 : i32
    %c0_i32_1 = arith.constant 0 : i32
    return %arg0, %c0_i32, %c0_i32_0 : i32, i32, i32
  }
  func.func @transform_1(%arg0: i32) -> (i32, i32) {
    %c0_i32 = arith.constant 0 : i32
    %c0_i32_0 = arith.constant 0 : i32
    %c0_i32_1 = arith.constant 0 : i32
    return %c0_i32, %c0_i32_0 : i32, i32
  }
  func.func @transform_2(%arg0: i32) -> (i32, i32) {
    %c0_i32 = arith.constant 0 : i32
    %c0_i32_0 = arith.constant 0 : i32
    %c0_i32_1 = arith.constant 0 : i32
    return %c0_i32, %c0_i32_0 : i32, i32
  }
  func.func @transform_3(%arg0: i32) -> (i32, i32, i32) {
    %c0_i32 = arith.constant 0 : i32
    %c0_i32_0 = arith.constant 0 : i32
    %c0_i32_1 = arith.constant 0 : i32
    return %arg0, %c0_i32, %c0_i32_0 : i32, i32, i32
  }
}

</mosaic_0001>

<bundles_post_ra>
// kernel: tpu_custom_call.1
= control target key start
LH: loop header
LB: loop body
LE: loop exit
PB: predicated region body
PF: predicated region fallthrough
CT: control target
= control target key end

     0   :  { %8 = vsyncpa [#allocation3], 0  ;;  %s651_s0 = inlined_call_operand.hbm [shape: f32[1,8,256], index: 0, kind: input, shape index: {}]   ;;  %s652_s1 = inlined_call_operand.vmem [shape: f32[8,9], index: 1, kind: input, shape index: {}]   ;;  %s653_s2 = inlined_call_operand.vmem [shape: f32[8,4], index: 2, kind: input, shape index: {}]   ;;  %s654_s3 = inlined_call_operand.hbm [shape: f32[1,16,256], index: 3, kind: output, shape index: {}]  }
   0x1   :  { %9 = vsyncpa [#allocation4], 0  ;;  %s445_s12 = smov [#allocation2]   ;;  %s397_s16 = scalar_lea.hbm %s651_s0, 256 }
   0x2   :  { %s16_s13 = sshll.u32 %s445_s12, 4  ;;  %p398_p0 = scmp.ne.s32.totalorder %s651_s0, %s397_s16  ;;  %s17_s13 = int_to_ptr.vmem [resolvable:$true] %s16_s13 }
   0x3   :  { %p401_p1 = scmp.lt.u32.totalorder %s397_s16, %s651_s0 }
   0x5   :  { %p403_p2 = pnand %p401_p1, %p398_p0 }
   0x7   :  { %406 = shalt.err (!%p403_p2)
}
   0x8   :  { %s407_s21 = scalar_lea.vmem %s17_s13, 256  ;;  %p412_p4 = scmp.lt.s32.totalorder %s17_s13, %s17_s13 }
   0x9   :  { %p408_p3 = scmp.ne.s32.totalorder %s17_s13, %s407_s21  ;;  %p413_p5 = scmp.lt.s32.totalorder %s407_s21, %s407_s21 }
   0xb   :  { %p414_p6 = por %p413_p5, %p412_p4 }
   0xd   :  { %p415_p7 = pnand %p414_p6, %p408_p3 }
   0xf   :  { %418 = shalt.err (!%p415_p7)
}
  0x10   :  { %19 = dma.hbm_to_vmem [thread:$0]  %s651_s0, 256, %s17_s13, [#allocation3]  }
  0x11   :  { %441 = dma.done.wait [#allocation3], 256  }
  0x12   :  { %442 = vsyncadd [#allocation3], 4294967040  ;;  %v446_v0 = vmov 2   ;;  %v447_v1 = vmov 1   ;;  %v27_v2 = vld [vmem:[%s652_s1] sm:$0xff]  ;;  %v500_v3 = vld [vmem:[#allocation2 + $0x8] sm:$0xff]  ;;  %v31_v19 = vlaneseq }
  0x13   :  { %386 = vset.pattern.permute.xlu1 %v446_v0  ;;  %385 = vset.pattern.permute.xlu0 %v447_v1  ;;  %v448_v4 = vmov 3   ;;  %s449_s26 = smov 17   ;;  %v450_v5 = vmov 5   ;;  %v503_v6 = vld [vmem:[#allocation2] sm:$0xff]  ;;  %s451_s0 = smov 16   ;;  %v452_v7 = vmov 4  }
  0x14   :  { %111 = vperm.xlu1 %386, %v27_v2   ;;  %90 = vperm.xlu0 %385, %v27_v2   ;;  %s453_s1 = smov 15   ;;  %v454_v8 = vmov 6   ;;  %v455_v9 = vmov 7   ;;  %s456_s27 = smov 1   ;;  %v457_v10 = vmov 0   ;;  %v461_v11 = vmov 8  }
  0x15   :  { %s458_s28 = smov 127   ;;  %s459_s29 = smov 113   ;;  %v28_v12 = vld [vmem:[%s653_s2] sm:$0xff]  ;;  %v528_v22 = vand.u32 127, %v31_v19 }
  0x16   :  { %s460_s30 = smov 112   ;;  %s462_s4 = smov 111  }
  0x17   :  { %v33_v25 = vadd.s32 128, %v528_v22  ;;  %v34_v26 = vshra.s32 %v528_v22, 4  ;;  %v36_v27 = vand.u32 15, %v528_v22  ;;  %vm58_vm2 = vcmp.lt.s32.totalorder %v528_v22, 17  ;;  %s463_s2 = smov [#allocation5]  }
  0x18   :  { %387 = vset.pattern.permute.xlu1 %v448_v4  ;;  %56 = vrot.lane.b32.xlu0 %v500_v3, %s449_s26  ;;  %vm80_vm4 = vcmp.lt.s32.totalorder %v528_v22, 16  ;;  %vm101_vm10 = vcmp.lt.s32.totalorder %v528_v22, 15  ;;  %vm122_vm11 = vcmp.lt.s32.totalorder %v528_v22, 1  ;;  %vm151_vm14 = vcmp.lt.s32.totalorder %v528_v22, 127  ;;  %s353_s7 = sshll.u32 %s463_s2, 4  ;;  %s354_s7 = int_to_ptr.vmem [resolvable:$true] %s353_s7 }
  0x19   :  { %132 = vperm.xlu1 %387, %v27_v2   ;;  %389 = vset.pattern.permute.xlu0 %v450_v5  ;;  %v35_v29 = vshra.s32 %v33_v25, 4  ;;  %v37_v30 = vand.u32 15, %v33_v25  ;;  %vm539_vm0 = vcmp.ge.s32.totalorder %v34_v26, 1  ;;  %vm543_vm1 = vcmp.ge.s32.totalorder %v36_v27, 1  ;;  %s419_s8 = scalar_lea.vmem %s354_s7, 512  ;;  %p424_p9 = scmp.lt.s32.totalorder %s354_s7, %s354_s7 }
  0x1a   :  { %vm557_vm6 = vcmp.lt.s32.totalorder %v36_v27, 15  ;;  %vm42_vm7 = vmand %vm539_vm0, %vm543_vm1  ;;  %vm592_vm15 = vcmp.lt.s32.totalorder %v34_v26, 15  ;;  %p420_p8 = scmp.ne.s32.totalorder %s354_s7, %s419_s8  ;;  %p425_p10 = scmp.lt.s32.totalorder %s419_s8, %s419_s8 }
  0x1b   :  { %vm548_vm3 = vcmp.ge.s32.totalorder %v35_v29, 1  ;;  %vm553_vm5 = vcmp.ge.s32.totalorder %v37_v30, 1  ;;  %vm569_vm9 = vcmp.lt.s32.totalorder %v37_v30, 15  ;;  %vm46_vm12 = vmand %vm539_vm0, %vm557_vm6 }
  0x1c   :  { %78 = vrot.lane.b32.xlu0 %v500_v3, %s451_s0  ;;  %vm43_vm8 = vmand %vm548_vm3, %vm553_vm5  ;;  %p426_p11 = por %p425_p10, %p424_p9 }
  0x1d   :  { %54 = vrot.lane.b32.xlu1 %v503_v6, %s449_s26  ;;  %vm47_vm13 = vmand %vm548_vm3, %vm569_vm9 }
  0x1e   :  { %388 = vset.pattern.permute.xlu1 %v452_v7  ;;  %p427_p12 = pnand %p426_p11, %p420_p8 }
  0x20   :  { %97 = vrot.lane.b32.xlu0 %v503_v6, %s453_s1 }
  0x21   :  { %76 = vrot.lane.b32.xlu1 %v503_v6, %s451_s0 }
  0x24   :  { %161 = vperm.xlu0 %389, %v27_v2  }
  0x25   :  { %140 = vperm.xlu1 %388, %v27_v2  }
  0x28   :  { %390 = vset.pattern.permute.xlu0 %v454_v8 }
  0x29   :  { %99 = vrot.lane.b32.xlu1 %v500_v3, %s453_s1  ;;  %182 = vperm.xlu0 %390, %v27_v2  }
  0x2a   :  { %392 = vset.pattern.permute.xlu1 %v455_v9 }
  0x2d   :  { %118 = vrot.lane.b32.xlu1 %v503_v6, %s456_s27  ;;  %391 = vset.pattern.permute.xlu0 %v457_v10 }
  0x2e   :  { %69 = vperm.xlu0 %391, %v27_v2  }
  0x31   :  { %120 = vrot.lane.b32.xlu1 %v500_v3, %s456_s27 }
  0x32   :  { %149 = vrot.lane.b32.xlu0 %v500_v3, %s458_s28 }
  0x35   :  { %203 = vperm.xlu1 %392, %v27_v2  }
  0x36   :  { %168 = vrot.lane.b32.xlu0 %v503_v6, %s459_s29 }
  0x39   :  { %147 = vrot.lane.b32.xlu1 %v503_v6, %s458_s28 }
  0x3a   :  { %189 = vrot.lane.b32.xlu0 %v503_v6, %s460_s30  ;;  %393 = vset.pattern.permute.xlu1 %v461_v11 }
  0x3d   :  { %224 = vperm.xlu1 %393, %v27_v2  }
  0x3e   :  { %210 = vrot.lane.b32.xlu0 %v503_v6, %s462_s4 }
  0x41   :  { %170 = vrot.lane.b32.xlu1 %v500_v3, %s459_s29 }
  0x42   :  { %233 = vperm.xlu0 %391, %v28_v12   ;;  %394 = vset.pattern.permute.xlu1 %v447_v1 }
  0x45   :  { %191 = vrot.lane.b32.xlu1 %v500_v3, %s460_s30 }
  0x46   :  { %396 = vset.pattern.permute.xlu0 %v448_v4 }
  0x47   :  { %281 = vperm.xlu0 %396, %v28_v12  }
  0x49   :  { %212 = vrot.lane.b32.xlu1 %v500_v3, %s462_s4 }
  0x4d   :  { %249 = vperm.xlu1 %394, %v28_v12  }
  0x51   :  { %395 = vset.pattern.permute.xlu1 %v446_v0 }
  0x52   :  { %265 = vperm.xlu1 %395, %v28_v12  }
  0x93   :  { %v112_v13 = vpop.permute.xlu1 %111  ;;  %v91_v14 = vpop.permute.xlu0 %90 }
  0x97   :  { %v57_v15 = vpop.permute.xlu0 %56 }
  0x98   :  { %v525_v16 = vpop.permute.xlu1 %132 }
  0x9b   :  { %v79_v17 = vpop.permute.xlu0 %78 }
  0x9c   :  { %v55_v18 = vpop.permute.xlu1 %54 }
  0x9d   :  { %v59_v38 = vsel %vm58_vm2, %v55_v18, %v57_v15  ;;  %v60_v39 = vsel %vm58_vm2, %v57_v15, %v55_v18  ;;  %vm50_vm2 = vmand %vm592_vm15, %vm543_vm1 }
  0x9e   :  { %v65_v47 = vsel %vm42_vm7, %v60_v39, 0.0  ;;  %v66_v48 = vsel %vm43_vm8, %v59_v38, 0.0  ;;  %vm214_vm7 = vcmp.lt.s32.totalorder %v528_v22, 111 }
  0x9f   :  { %v98_v20 = vpop.permute.xlu0 %97 }
  0xa0   :  { %v77_v21 = vpop.permute.xlu1 %76 }
  0xa1   :  { %v81_v40 = vsel %vm80_vm4, %v77_v21, %v79_v17  ;;  %v82_v41 = vsel %vm80_vm4, %v79_v17, %v77_v21 }
  0xa2   :  { %v87_v45 = vsel %vm539_vm0, %v82_v41, 0.0  ;;  %v88_v46 = vsel %vm548_vm3, %v81_v40, 0.0  ;;  %vm596_vm0 = vcmp.lt.s32.totalorder %v35_v29, 15  ;;  %vm172_vm3 = vcmp.lt.s32.totalorder %v528_v22, 113 }
  0xa3   :  { %v532_v24 = vpop.permute.xlu0 %161  ;;  %v93_v54 = vmul.f32 %v91_v14, %v87_v45  ;;  %v94_v55 = vmul.f32 %v91_v14, %v88_v46  ;;  %vm51_vm4 = vmand %vm596_vm0, %vm553_vm5 }
  0xa4   :  { %v530_v23 = vpop.permute.xlu1 %140  ;;  %vm53_vm8 = vmand %vm596_vm0, %vm569_vm9 }
  0xa5   :  { %v143_v27 = vmul.f32 %v530_v23, %v503_v6 }
  0xa8   :  { %v100_v28 = vpop.permute.xlu1 %99  ;;  %v537_v31 = vpop.permute.xlu0 %182 }
  0xa9   :  { %v102_v49 = vsel %vm101_vm10, %v98_v20, %v100_v28  ;;  %v103_v50 = vsel %vm101_vm10, %v100_v28, %v98_v20  ;;  %v144_v28 = vmul.f32 %v530_v23, %v500_v3  ;;  %v237_v23 = vshrl.u32 %v31_v19, 7 }
  0xaa   :  { %v108_v59 = vsel %vm46_vm12, %v103_v50, 0.0  ;;  %v109_v60 = vsel %vm47_vm13, %v102_v49, 0.0 }
  0xab   :  { %v114_v2 = vmul.f32 %v112_v13, %v108_v59  ;;  %v115_v4 = vmul.f32 %v112_v13, %v109_v60  ;;  %v286_v59 = vsub.s32 3, %v237_v23  ;;  %v336_v60 = vsub.s32 7, %v237_v23 }
  0xac   :  { %v119_v33 = vpop.permute.xlu1 %118  ;;  %v324_v5 = vsub.s32 6, %v237_v23 }
  0xad   :  { %v70_v42 = vpop.permute.xlu0 %69 }
  0xae   :  { %v72_v51 = vmul.f32 %v70_v42, %v65_v47  ;;  %v73_v52 = vmul.f32 %v70_v42, %v66_v48 }
  0xb0   :  { %v121_v43 = vpop.permute.xlu1 %120  ;;  %v95_v61 = vadd.f32 %v93_v54, %v72_v51  ;;  %v96_v62 = vadd.f32 %v94_v55, %v73_v52  ;;  %v312_v54 = vsub.s32 5, %v237_v23 }
  0xb1   :  { %v123_v56 = vsel %vm122_vm11, %v119_v33, %v121_v43  ;;  %v124_v57 = vsel %vm122_vm11, %v121_v43, %v119_v33  ;;  %v150_v58 = vpop.permute.xlu0 %149 }
  0xb2   :  { %v129_v0 = vsel %vm543_vm1, %v124_v57, 0.0  ;;  %v130_v1 = vsel %vm553_vm5, %v123_v56, 0.0  ;;  %v116_v8 = vadd.f32 %v114_v2, %v95_v61  ;;  %v117_v9 = vadd.f32 %v115_v4, %v96_v62  ;;  %vm52_vm5 = vmand %vm592_vm15, %vm557_vm6 }
  0xb3   :  { %v135_v10 = vmul.f32 %v525_v16, %v129_v0  ;;  %v136_v11 = vmul.f32 %v525_v16, %v130_v1  ;;  %vm193_vm1 = vcmp.lt.s32.totalorder %v528_v22, 112  ;;  %v254_v22 = vsub.s32 1, %v237_v23 }
  0xb4   :  { %v204_v53 = vpop.permute.xlu1 %203  ;;  %v238_v61 = vsub.s32 0, %v237_v23  ;;  %v270_v62 = vsub.s32 2, %v237_v23  ;;  %v300_v4 = vsub.s32 4, %v237_v23 }
  0xb5   :  { %v169_v12 = vpop.permute.xlu0 %168  ;;  %v137_v17 = vadd.f32 %v135_v10, %v116_v8  ;;  %v138_v18 = vadd.f32 %v136_v11, %v117_v9 }
  0xb7   :  { %v145_v35 = vadd.f32 %v143_v27, %v137_v17  ;;  %v146_v36 = vadd.f32 %v144_v28, %v138_v18 }
  0xb8   :  { %v148_v63 = vpop.permute.xlu1 %147 }
  0xb9   :  { %v152_v15 = vsel %vm151_vm14, %v148_v63, %v150_v58  ;;  %v153_v13 = vsel %vm151_vm14, %v150_v58, %v148_v63  ;;  %v190_v29 = vpop.permute.xlu0 %189 }
  0xba   :  { %v158_v16 = vsel %vm557_vm6, %v152_v15, 0.0  ;;  %v159_v20 = vsel %vm569_vm9, %v153_v13, 0.0 }
  0xbb   :  { %v164_v33 = vmul.f32 %v532_v24, %v158_v16  ;;  %v165_v34 = vmul.f32 %v532_v24, %v159_v20 }
  0xbc   :  { %v225_v14 = vpop.permute.xlu1 %224 }
  0xbd   :  { %v166_v24 = vadd.f32 %v164_v33, %v145_v35  ;;  %v167_v43 = vadd.f32 %v165_v34, %v146_v36  ;;  %v211_v46 = vpop.permute.xlu0 %210 }
  0xc0   :  { %v171_v21 = vpop.permute.xlu1 %170 }
  0xc1   :  { %v173_v25 = vsel %vm172_vm3, %v169_v12, %v171_v21  ;;  %v174_v26 = vsel %vm172_vm3, %v171_v21, %v169_v12  ;;  %v234_v11 = vpop.permute.xlu0 %233 }
  0xc2   :  { %v179_v30 = vsel %vm50_vm2, %v173_v25, 0.0  ;;  %v180_v32 = vsel %vm51_vm4, %v174_v26, 0.0 }
  0xc3   :  { %v185_v39 = vmul.f32 %v537_v31, %v179_v30  ;;  %v186_v40 = vmul.f32 %v537_v31, %v180_v32 }
  0xc4   :  { %v192_v38 = vpop.permute.xlu1 %191 }
  0xc5   :  { %v194_v41 = vsel %vm193_vm1, %v190_v29, %v192_v38  ;;  %v195_v42 = vsel %vm193_vm1, %v192_v38, %v190_v29  ;;  %v187_v48 = vadd.f32 %v185_v39, %v166_v24  ;;  %v188_v37 = vadd.f32 %v186_v40, %v167_v43 }
  0xc6   :  { %v200_v6 = vsel %vm592_vm15, %v194_v41, 0.0  ;;  %v201_v3 = vsel %vm596_vm0, %v195_v42, 0.0  ;;  %v282_v34 = vpop.permute.xlu0 %281 }
  0xc7   :  { %v206_v31 = vmul.f32 %v204_v53, %v200_v6  ;;  %v207_v45 = vmul.f32 %v204_v53, %v201_v3 }
  0xc8   :  { %v213_v47 = vpop.permute.xlu1 %212 }
  0xc9   :  { %v215_v49 = vsel %vm214_vm7, %v211_v46, %v213_v47  ;;  %v216_v50 = vsel %vm214_vm7, %v213_v47, %v211_v46  ;;  %v208_v19 = vadd.f32 %v206_v31, %v187_v48  ;;  %v209_v55 = vadd.f32 %v207_v45, %v188_v37 }
  0xca   :  { %v221_v51 = vsel %vm52_vm5, %v215_v49, 0.0  ;;  %v222_v52 = vsel %vm53_vm8, %v216_v50, 0.0 }
  0xcb   :  { %v227_v56 = vmul.f32 %v225_v14, %v221_v51  ;;  %v228_v57 = vmul.f32 %v225_v14, %v222_v52 }
  0xcc   :  { %v250_v53 = vpop.permute.xlu1 %249 }
  0xcd   :  { %v229_v58 = vadd.f32 %v227_v56, %v208_v19  ;;  %v230_v44 = vadd.f32 %v228_v57, %v209_v55 }
  0xcf   :  { %v255_v63 = vrot.slane %v229_v58, %v254_v22  ;;  %v259_v0 = vrot.slane %v230_v44, %v254_v22  ;;  %v313_v1 = vrot.slane %v229_v58, %v312_v54  ;;  %v317_v2 = vrot.slane %v230_v44, %v312_v54 }
  0xd0   :  { %v287_v7 = vrot.slane %v229_v58, %v286_v59  ;;  %v291_v8 = vrot.slane %v230_v44, %v286_v59  ;;  %v337_v9 = vrot.slane %v229_v58, %v336_v60  ;;  %v341_v10 = vrot.slane %v230_v44, %v336_v60 }
  0xd1   :  { %v260_v12 = vmul.f32 %v255_v63, %v250_v53  ;;  %v261_v14 = vmul.f32 %v259_v0, %v250_v53  ;;  %v318_v15 = vmul.f32 %v313_v1, %v250_v53  ;;  %v319_v13 = vmul.f32 %v317_v2, %v250_v53  ;;  %v266_v17 = vpop.permute.xlu1 %265 }
  0xd2   :  { %v239_v18 = vrot.slane %v229_v58, %v238_v61  ;;  %v243_v16 = vrot.slane %v230_v44, %v238_v61  ;;  %v271_v20 = vrot.slane %v229_v58, %v270_v62  ;;  %v275_v21 = vrot.slane %v230_v44, %v270_v62 }
  0xd3   :  { %v301_v25 = vrot.slane %v229_v58, %v300_v4  ;;  %v305_v26 = vrot.slane %v230_v44, %v300_v4  ;;  %v325_v27 = vrot.slane %v229_v58, %v324_v5  ;;  %v329_v28 = vrot.slane %v230_v44, %v324_v5 }
  0xd4   :  { %v244_v29 = vmul.f32 %v239_v18, %v234_v11  ;;  %v245_v30 = vmul.f32 %v243_v16, %v234_v11  ;;  %v276_v32 = vmul.f32 %v271_v20, %v266_v17  ;;  %v277_v33 = vmul.f32 %v275_v21, %v266_v17 }
  0xd5   :  { %v306_v35 = vmul.f32 %v301_v25, %v234_v11  ;;  %v307_v36 = vmul.f32 %v305_v26, %v234_v11  ;;  %v330_v38 = vmul.f32 %v325_v27, %v266_v17  ;;  %v331_v39 = vmul.f32 %v329_v28, %v266_v17 }
  0xd6   :  { %v262_v40 = vadd.f32 %v260_v12, %v244_v29  ;;  %v263_v41 = vadd.f32 %v261_v14, %v245_v30  ;;  %v292_v3 = vmul.f32 %v287_v7, %v282_v34  ;;  %v293_v23 = vmul.f32 %v291_v8, %v282_v34 }
  0xd7   :  { %v320_v42 = vadd.f32 %v318_v15, %v306_v35  ;;  %v321_v6 = vadd.f32 %v319_v13, %v307_v36  ;;  %v342_v31 = vmul.f32 %v337_v9, %v282_v34  ;;  %v343_v45 = vmul.f32 %v341_v10, %v282_v34 }
  0xd8   :  { %v278_v24 = vadd.f32 %v276_v32, %v262_v40  ;;  %v279_v43 = vadd.f32 %v277_v33, %v263_v41 }
  0xd9   :  { %v332_v46 = vadd.f32 %v330_v38, %v320_v42  ;;  %v333_v47 = vadd.f32 %v331_v39, %v321_v6 }
  0xda   :  { %v294_v48 = vadd.f32 %v292_v3, %v278_v24  ;;  %v295_v37 = vadd.f32 %v293_v23, %v279_v43 }
  0xdb   :  { %v344_v49 = vadd.f32 %v342_v31, %v332_v46  ;;  %v345_v50 = vadd.f32 %v343_v45, %v333_v47 }
  0xdc   :  { %296 = vst [vmem:[#allocation5] sm:$0xff] %v294_v48  ;;  %297 = vst [vmem:[#allocation5 + $0x8] sm:$0xff] %v295_v37 }
  0xdd   :  { %346 = vst [vmem:[#allocation5 + $0x10] sm:$0xff] %v344_v49  ;;  %347 = vst [vmem:[#allocation5 + $0x18] sm:$0xff] %v345_v50 }
  0xde   :  { %430 = shalt.err (!%p427_p12)
}
  0xdf   :  { %s431_s11 = scalar_lea.hbm %s654_s3, 512 }
  0xe0   :  { %p432_p13 = scmp.ne.s32.totalorder %s654_s3, %s431_s11  ;;  %p435_p0 = scmp.lt.u32.totalorder %s431_s11, %s654_s3 }
  0xe2   :  { %p437_p1 = pnand %p435_p0, %p432_p13 }
  0xe4   :  { %440 = shalt.err (!%p437_p1)
}
  0xe5   :  { %s464_s16 = smov 256  }
  0xe6   :  { %359 = dma.vmem_to_hbm [thread:$0]  %s354_s7, 512, %s654_s3, [#allocation4], %s464_s16, %s464_s16, %s451_s0  }
  0xe7   :  { %443 = dma.done.wait [#allocation4], 512  }
  0xe8   :  { %444 = vsyncadd [#allocation4], 4294966784 }
  0xe9   :  { %363 = vsyncpa [#allocation3], 1 }
  0xea   :  { %364 = vsyncpa [#allocation4], 1 }

</bundles_post_ra>
